<compile_context>
chip_gen: v7x
topology: tpu7x:2x2x1
jax: 0.10.0
libtpu: 0.0.40
codegen_flags: <defaults>
</compile_context>

<pallas_src>
import jax
import jax.numpy as jnp
from jax.experimental import pallas as pl
from jax.experimental.pallas import tpu as pltpu


DIMS = [100, 256, 128, 64, 32, 10]          # real layer widths
PAD_DIMS = [128, 256, 128, 128, 128, 128]   # lane-aligned (zero-padded) widths
IN_PAD = PAD_DIMS[0]
OUT_PAD = PAD_DIMS[-1]


# ---------------------------------------------------------------------------
# Kernel: fused 5-layer MLP on one (TB, 128) batch tile
# ---------------------------------------------------------------------------
def encoder_mlp_kernel(
    x_ref,
    w1_ref, b1_ref,
    w2_ref, b2_ref,
    w3_ref, b3_ref,
    w4_ref, b4_ref,
    w5_ref, b5_ref,
    o_ref,
):
    # x tile: (TB, 128) bf16.  Weights bf16, biases f32, accumulate in f32.
    # All widths are lane-dense (128 / 256), so bias-add/ReLU/casts are
    # full-vreg ops and every matmul has 128-aligned K and N.
    h = x_ref[...]

    # Linear(128pad, 256) + ReLU
    h = jnp.dot(h, w1_ref[...], preferred_element_type=jnp.float32) + b1_ref[...]
    h = jnp.maximum(h, 0.0).astype(jnp.bfloat16)

    # Linear(256, 128) + ReLU
    h = jnp.dot(h, w2_ref[...], preferred_element_type=jnp.float32) + b2_ref[...]
    h = jnp.maximum(h, 0.0).astype(jnp.bfloat16)

    # Linear(128, 128pad[64]) + ReLU   (lanes >= 64 are exact zeros)
    h = jnp.dot(h, w3_ref[...], preferred_element_type=jnp.float32) + b3_ref[...]
    h = jnp.maximum(h, 0.0).astype(jnp.bfloat16)

    # Linear(128pad[64], 128pad[32]) + ReLU
    h = jnp.dot(h, w4_ref[...], preferred_element_type=jnp.float32) + b4_ref[...]
    h = jnp.maximum(h, 0.0).astype(jnp.bfloat16)

    # Linear(128pad[32], 128pad[10])  (no activation); valid logits in lanes [0,10)
    h = jnp.dot(h, w5_ref[...], preferred_element_type=jnp.float32) + b5_ref[...]
    o_ref[...] = h.astype(o_ref.dtype)


# ---------------------------------------------------------------------------
# Tiling helpers
# ---------------------------------------------------------------------------
def _round_up(n, m):
    return ((n + m - 1) // m) * m


_STEP_OVERHEAD_ROWS = 96  # ~0.35 us per grid step, expressed as row-equivalents


def _choose_tile(b_rows):
    """Pick (TB, b_pad) for a batch of b_rows (already a multiple of 8).

    Constraints / goals:
      * TB <= b_rows // 2 when possible -> grid >= 2 so both v7x TensorCores
        get work under "parallel" semantics.
      * TB <= 1024 -> VMEM use stays a few MB (safe on v7x's 64 MiB).
      * Minimize  padded_rows + overhead * num_steps  (padding waste vs.
        per-grid-step cost), so awkward batch sizes don't pad 2x.
    """
    max_tb = min(1024, max(8, (b_rows // 2) // 8 * 8))
    best = None
    for tb in (1024, 512, 256, 128, 64, 32, 16, 8):
        if tb > max_tb:
            continue
        b_pad = _round_up(b_rows, tb)
        score = b_pad + _STEP_OVERHEAD_ROWS * (b_pad // tb)
        if best is None or score < best[0]:
            best = (score, tb, b_pad)
    _, tb, b_pad = best
    return tb, b_pad


# ---------------------------------------------------------------------------
# One-time parameter packing: weights bf16 [K_pad, N_pad], biases f32 [1, N_pad]
# ---------------------------------------------------------------------------
def pack_params(params):
    packed = []
    for i, (w, b) in enumerate(params):
        kp, np_ = PAD_DIMS[i], PAD_DIMS[i + 1]
        w = w.astype(jnp.float32)
        b = b.astype(jnp.float32).reshape(1, -1)
        w_p = jnp.zeros((kp, np_), jnp.float32).at[: w.shape[0], : w.shape[1]].set(w)
        b_p = jnp.zeros((1, np_), jnp.float32).at[:, : b.shape[1]].set(b)
        packed.append((w_p.astype(jnp.bfloat16), b_p))  # biases stay f32
    return packed


# ---------------------------------------------------------------------------
# Forward (jitted end-to-end: pad/cast + pallas_call + slice all fuse)
# ---------------------------------------------------------------------------
@jax.jit
def encoder_forward(x, packed_params):
    """x: (B, 1, 10, 10) or (B, 100). packed_params: from pack_params().
    Returns (B, 10) float32."""
    B = x.shape[0]
    x2d = x.reshape(B, -1)
    assert x2d.shape[1] == DIMS[0], "Encoder expects 10*10 = 100 input features"

    b_rows = _round_up(max(B, 8), 8)
    TB, b_pad = _choose_tile(b_rows)

    x_pad = jnp.zeros((b_pad, IN_PAD), jnp.bfloat16)
    x_pad = x_pad.at[:B, : DIMS[0]].set(x2d.astype(jnp.bfloat16))

    operands = [x_pad]
    in_specs = [pl.BlockSpec((TB, IN_PAD), lambda i: (i, 0))]  # streamed x tile
    for w, b in packed_params:
        operands += [w, b]
        # Full-array blocks, same block every step -> stay VMEM-resident.
        in_specs += [
            pl.BlockSpec(w.shape, lambda i: (0, 0)),
            pl.BlockSpec(b.shape, lambda i: (0, 0)),
        ]

    flops = 2 * b_pad * sum(PAD_DIMS[i] * PAD_DIMS[i + 1] for i in range(5))
    bytes_accessed = (
        b_pad * IN_PAD * 2                               # x in (bf16)
        + b_pad * OUT_PAD * 2                            # out (bf16)
        + sum(int(w.size) * 2 for w, _ in packed_params) # weights (bf16)
        + sum(int(b.size) * 4 for _, b in packed_params) # biases (f32)
    )

    out = pl.pallas_call(
        encoder_mlp_kernel,
        out_shape=jax.ShapeDtypeStruct((b_pad, OUT_PAD), jnp.bfloat16),
        grid=(b_pad // TB,),
        in_specs=in_specs,
        out_specs=pl.BlockSpec((TB, OUT_PAD), lambda i: (i, 0)),
        compiler_params=pltpu.CompilerParams(
            dimension_semantics=("parallel",)),   # megacore split on v7x
        cost_estimate=pl.CostEstimate(
            flops=flops, transcendentals=0, bytes_accessed=bytes_accessed),
    )(*operands)

    return out[:B, : DIMS[-1]].astype(jnp.float32)


# ---------------------------------------------------------------------------
# Deterministic parameter init (mirrors nn.Linear default: U(-1/sqrt(fan_in), +))
# ---------------------------------------------------------------------------
def init_params(key):
    params = []
    for i in range(len(DIMS) - 1):
        fan_in, fan_out = DIMS[i], DIMS[i + 1]
        key, kw, kb = jax.random.split(key, 3)
        bound = 1.0 / jnp.sqrt(jnp.float32(fan_in))
        # Stored directly as [in, out] (transpose of PyTorch's [out, in]).
        w = jax.random.uniform(kw, (fan_in, fan_out), jnp.float32, -bound, bound)
        b = jax.random.uniform(kb, (fan_out,), jnp.float32, -bound, bound)
        params.append((w, b))
    return params


# ---------------------------------------------------------------------------
# Pure-JAX f32 reference for correctness checks
# ---------------------------------------------------------------------------
def encoder_ref(x, params):
    h = x.reshape(x.shape[0], -1).astype(jnp.float32)
    for i, (w, b) in enumerate(params):
        h = h @ w + b
        if i < len(params) - 1:
            h = jnp.maximum(h, 0.0)
    return h


if __name__ == "__main__":
    key = jax.random.PRNGKey(0)
    kx, kp, kx2 = jax.random.split(key, 3)
    params = init_params(kp)
    packed = pack_params(params)

    # Small deterministic input: batch=2, single-channel 10x10 "image".
    x = jax.random.normal(kx, (2, 1, 10, 10), dtype=jnp.float32)
    out = jax.block_until_ready(encoder_forward(x, packed))
    ref = encoder_ref(x, params)
    assert out.shape == (2, 10), out.shape
    # bf16 weights/activations/output with f32 accumulation -> loose tolerance.
    assert jnp.allclose(out, ref, atol=5e-2, rtol=5e-2), "mismatch vs reference (B=2)"

    # Multi-tile path (grid > 1, padded tail rows discarded by the wrapper).
    x_big = jax.random.normal(kx2, (600, 1, 10, 10), dtype=jnp.float32)
    out_big = jax.block_until_ready(encoder_forward(x_big, packed))
    ref_big = encoder_ref(x_big, params)
    assert out_big.shape == (600, 10), out_big.shape
    assert jnp.allclose(out_big, ref_big, atol=5e-2, rtol=5e-2), "mismatch (B=600)"

    print("KERNEL_OK")
</pallas_src>

<mosaic_0001>
module attributes {stable_mosaic.version = 11 : i64} {
  func.func @encoder_mlp_kernel(%arg0: i32, %arg1: memref<8x128xbf16, #tpu.memory_space<vmem>>, %arg2: memref<128x256xbf16, #tpu.memory_space<vmem>>, %arg3: memref<1x256xf32, #tpu.memory_space<vmem>>, %arg4: memref<256x128xbf16, #tpu.memory_space<vmem>>, %arg5: memref<1x128xf32, #tpu.memory_space<vmem>>, %arg6: memref<128x128xbf16, #tpu.memory_space<vmem>>, %arg7: memref<1x128xf32, #tpu.memory_space<vmem>>, %arg8: memref<128x128xbf16, #tpu.memory_space<vmem>>, %arg9: memref<1x128xf32, #tpu.memory_space<vmem>>, %arg10: memref<128x128xbf16, #tpu.memory_space<vmem>>, %arg11: memref<1x128xf32, #tpu.memory_space<vmem>>, %arg12: memref<8x128xbf16, #tpu.memory_space<vmem>>) attributes {dimension_semantics = [#tpu.dimension_semantics<parallel>], iteration_bounds = array<i64: 1>, scalar_prefetch = 0 : i64, scratch_operands = 0 : i64, tpu.core_type = #tpu.core_type<tc>, window_params = [{transform_indices = @transform_0, window_bounds = array<i64: 8, 128>}, {pipeline_mode = #tpu.pipeline_mode<synchronous>, transform_indices = @transform_1, window_bounds = array<i64: 128, 256>}, {pipeline_mode = #tpu.pipeline_mode<synchronous>, transform_indices = @transform_2, window_bounds = array<i64: 1, 256>}, {pipeline_mode = #tpu.pipeline_mode<synchronous>, transform_indices = @transform_3, window_bounds = array<i64: 256, 128>}, {pipeline_mode = #tpu.pipeline_mode<synchronous>, transform_indices = @transform_4, window_bounds = array<i64: 1, 128>}, {pipeline_mode = #tpu.pipeline_mode<synchronous>, transform_indices = @transform_5, window_bounds = array<i64: 128, 128>}, {pipeline_mode = #tpu.pipeline_mode<synchronous>, transform_indices = @transform_6, window_bounds = array<i64: 1, 128>}, {pipeline_mode = #tpu.pipeline_mode<synchronous>, transform_indices = @transform_7, window_bounds = array<i64: 128, 128>}, {pipeline_mode = #tpu.pipeline_mode<synchronous>, transform_indices = @transform_8, window_bounds = array<i64: 1, 128>}, {pipeline_mode = #tpu.pipeline_mode<synchronous>, transform_indices = @transform_9, window_bounds = array<i64: 128, 128>}, {pipeline_mode = #tpu.pipeline_mode<synchronous>, transform_indices = @transform_10, window_bounds = array<i64: 1, 128>}, {transform_indices = @transform_11, window_bounds = array<i64: 8, 128>}]} {
    %c0 = arith.constant 0 : index
    %c0_0 = arith.constant 0 : index
    %0 = vector.load %arg1[%c0, %c0_0] : memref<8x128xbf16, #tpu.memory_space<vmem>>, vector<8x128xbf16>
    %c0_1 = arith.constant 0 : index
    %c0_2 = arith.constant 0 : index
    %1 = vector.load %arg2[%c0_1, %c0_2] : memref<128x256xbf16, #tpu.memory_space<vmem>>, vector<128x256xbf16>
    %cst = arith.constant dense<0.000000e+00> : vector<8x256xf32>
    %2 = tpu.matmul %0, %1, %cst {dimension_numbers = #tpu.dot_dimension_numbers<[1], [0], [0], [1], [0, 0, 1, 1], [], []>} : vector<8x128xbf16>, vector<128x256xbf16>, vector<8x256xf32> -> vector<8x256xf32>
    %c0_3 = arith.constant 0 : index
    %c0_4 = arith.constant 0 : index
    %3 = vector.load %arg3[%c0_3, %c0_4] : memref<1x256xf32, #tpu.memory_space<vmem>>, vector<1x256xf32>
    %4 = vector.broadcast %3 : vector<1x256xf32> to vector<8x256xf32>
    %5 = arith.addf %2, %4 : vector<8x256xf32>
    %cst_5 = arith.constant 0.000000e+00 : f32
    %6 = vector.broadcast %cst_5 : f32 to vector<8x256xf32>
    %7 = arith.maximumf %5, %6 : vector<8x256xf32>
    %8 = arith.truncf %7 : vector<8x256xf32> to vector<8x256xbf16>
    %c0_6 = arith.constant 0 : index
    %c0_7 = arith.constant 0 : index
    %9 = vector.load %arg4[%c0_6, %c0_7] : memref<256x128xbf16, #tpu.memory_space<vmem>>, vector<256x128xbf16>
    %cst_8 = arith.constant dense<0.000000e+00> : vector<8x128xf32>
    %10 = tpu.matmul %8, %9, %cst_8 {dimension_numbers = #tpu.dot_dimension_numbers<[1], [0], [0], [1], [0, 0, 1, 1], [], []>} : vector<8x256xbf16>, vector<256x128xbf16>, vector<8x128xf32> -> vector<8x128xf32>
    %c0_9 = arith.constant 0 : index
    %c0_10 = arith.constant 0 : index
    %11 = vector.load %arg5[%c0_9, %c0_10] : memref<1x128xf32, #tpu.memory_space<vmem>>, vector<1x128xf32>
    %12 = vector.broadcast %11 : vector<1x128xf32> to vector<8x128xf32>
    %13 = arith.addf %10, %12 : vector<8x128xf32>
    %cst_11 = arith.constant 0.000000e+00 : f32
    %14 = vector.broadcast %cst_11 : f32 to vector<8x128xf32>
    %15 = arith.maximumf %13, %14 : vector<8x128xf32>
    %16 = arith.truncf %15 : vector<8x128xf32> to vector<8x128xbf16>
    %c0_12 = arith.constant 0 : index
    %c0_13 = arith.constant 0 : index
    %17 = vector.load %arg6[%c0_12, %c0_13] : memref<128x128xbf16, #tpu.memory_space<vmem>>, vector<128x128xbf16>
    %cst_14 = arith.constant dense<0.000000e+00> : vector<8x128xf32>
    %18 = tpu.matmul %16, %17, %cst_14 {dimension_numbers = #tpu.dot_dimension_numbers<[1], [0], [0], [1], [0, 0, 1, 1], [], []>} : vector<8x128xbf16>, vector<128x128xbf16>, vector<8x128xf32> -> vector<8x128xf32>
    %c0_15 = arith.constant 0 : index
    %c0_16 = arith.constant 0 : index
    %19 = vector.load %arg7[%c0_15, %c0_16] : memref<1x128xf32, #tpu.memory_space<vmem>>, vector<1x128xf32>
    %20 = vector.broadcast %19 : vector<1x128xf32> to vector<8x128xf32>
    %21 = arith.addf %18, %20 : vector<8x128xf32>
    %cst_17 = arith.constant 0.000000e+00 : f32
    %22 = vector.broadcast %cst_17 : f32 to vector<8x128xf32>
    %23 = arith.maximumf %21, %22 : vector<8x128xf32>
    %24 = arith.truncf %23 : vector<8x128xf32> to vector<8x128xbf16>
    %c0_18 = arith.constant 0 : index
    %c0_19 = arith.constant 0 : index
    %25 = vector.load %arg8[%c0_18, %c0_19] : memref<128x128xbf16, #tpu.memory_space<vmem>>, vector<128x128xbf16>
    %cst_20 = arith.constant dense<0.000000e+00> : vector<8x128xf32>
    %26 = tpu.matmul %24, %25, %cst_20 {dimension_numbers = #tpu.dot_dimension_numbers<[1], [0], [0], [1], [0, 0, 1, 1], [], []>} : vector<8x128xbf16>, vector<128x128xbf16>, vector<8x128xf32> -> vector<8x128xf32>
    %c0_21 = arith.constant 0 : index
    %c0_22 = arith.constant 0 : index
    %27 = vector.load %arg9[%c0_21, %c0_22] : memref<1x128xf32, #tpu.memory_space<vmem>>, vector<1x128xf32>
    %28 = vector.broadcast %27 : vector<1x128xf32> to vector<8x128xf32>
    %29 = arith.addf %26, %28 : vector<8x128xf32>
    %cst_23 = arith.constant 0.000000e+00 : f32
    %30 = vector.broadcast %cst_23 : f32 to vector<8x128xf32>
    %31 = arith.maximumf %29, %30 : vector<8x128xf32>
    %32 = arith.truncf %31 : vector<8x128xf32> to vector<8x128xbf16>
    %c0_24 = arith.constant 0 : index
    %c0_25 = arith.constant 0 : index
    %33 = vector.load %arg10[%c0_24, %c0_25] : memref<128x128xbf16, #tpu.memory_space<vmem>>, vector<128x128xbf16>
    %cst_26 = arith.constant dense<0.000000e+00> : vector<8x128xf32>
    %34 = tpu.matmul %32, %33, %cst_26 {dimension_numbers = #tpu.dot_dimension_numbers<[1], [0], [0], [1], [0, 0, 1, 1], [], []>} : vector<8x128xbf16>, vector<128x128xbf16>, vector<8x128xf32> -> vector<8x128xf32>
    %c0_27 = arith.constant 0 : index
    %c0_28 = arith.constant 0 : index
    %35 = vector.load %arg11[%c0_27, %c0_28] : memref<1x128xf32, #tpu.memory_space<vmem>>, vector<1x128xf32>
    %36 = vector.broadcast %35 : vector<1x128xf32> to vector<8x128xf32>
    %37 = arith.addf %34, %36 : vector<8x128xf32>
    %38 = arith.truncf %37 : vector<8x128xf32> to vector<8x128xbf16>
    %c0_29 = arith.constant 0 : index
    %c0_30 = arith.constant 0 : index
    %39 = vector.load %arg12[%c0_29, %c0_30] : memref<8x128xbf16, #tpu.memory_space<vmem>>, vector<8x128xbf16>
    tpu.vector_store %arg12[%c0_29, %c0_30], %38 {strides = array<i32>} : memref<8x128xbf16, #tpu.memory_space<vmem>>, vector<8x128xbf16>,
    return
  }
  func.func @transform_0(%arg0: i32) -> (i32, i32) {
    %c0_i32 = arith.constant 0 : i32
    %c0_i32_0 = arith.constant 0 : i32
    return %arg0, %c0_i32 : i32, i32
  }
  func.func @transform_1(%arg0: i32) -> (i32, i32) {
    %c0_i32 = arith.constant 0 : i32
    %c0_i32_0 = arith.constant 0 : i32
    %c0_i32_1 = arith.constant 0 : i32
    return %c0_i32, %c0_i32_0 : i32, i32
  }
  func.func @transform_2(%arg0: i32) -> (i32, i32) {
    %c0_i32 = arith.constant 0 : i32
    %c0_i32_0 = arith.constant 0 : i32
    %c0_i32_1 = arith.constant 0 : i32
    return %c0_i32, %c0_i32_0 : i32, i32
  }
  func.func @transform_3(%arg0: i32) -> (i32, i32) {
    %c0_i32 = arith.constant 0 : i32
    %c0_i32_0 = arith.constant 0 : i32
    %c0_i32_1 = arith.constant 0 : i32
    return %c0_i32, %c0_i32_0 : i32, i32
  }
  func.func @transform_4(%arg0: i32) -> (i32, i32) {
    %c0_i32 = arith.constant 0 : i32
    %c0_i32_0 = arith.constant 0 : i32
    %c0_i32_1 = arith.constant 0 : i32
    return %c0_i32, %c0_i32_0 : i32, i32
  }
  func.func @transform_5(%arg0: i32) -> (i32, i32) {
    %c0_i32 = arith.constant 0 : i32
    %c0_i32_0 = arith.constant 0 : i32
    %c0_i32_1 = arith.constant 0 : i32
    return %c0_i32, %c0_i32_0 : i32, i32
  }
  func.func @transform_6(%arg0: i32) -> (i32, i32) {
    %c0_i32 = arith.constant 0 : i32
    %c0_i32_0 = arith.constant 0 : i32
    %c0_i32_1 = arith.constant 0 : i32
    return %c0_i32, %c0_i32_0 : i32, i32
  }
  func.func @transform_7(%arg0: i32) -> (i32, i32) {
    %c0_i32 = arith.constant 0 : i32
    %c0_i32_0 = arith.constant 0 : i32
    %c0_i32_1 = arith.constant 0 : i32
    return %c0_i32, %c0_i32_0 : i32, i32
  }
  func.func @transform_8(%arg0: i32) -> (i32, i32) {
    %c0_i32 = arith.constant 0 : i32
    %c0_i32_0 = arith.constant 0 : i32
    %c0_i32_1 = arith.constant 0 : i32
    return %c0_i32, %c0_i32_0 : i32, i32
  }
  func.func @transform_9(%arg0: i32) -> (i32, i32) {
    %c0_i32 = arith.constant 0 : i32
    %c0_i32_0 = arith.constant 0 : i32
    %c0_i32_1 = arith.constant 0 : i32
    return %c0_i32, %c0_i32_0 : i32, i32
  }
  func.func @transform_10(%arg0: i32) -> (i32, i32) {
    %c0_i32 = arith.constant 0 : i32
    %c0_i32_0 = arith.constant 0 : i32
    %c0_i32_1 = arith.constant 0 : i32
    return %c0_i32, %c0_i32_0 : i32, i32
  }
  func.func @transform_11(%arg0: i32) -> (i32, i32) {
    %c0_i32 = arith.constant 0 : i32
    %c0_i32_0 = arith.constant 0 : i32
    return %arg0, %c0_i32 : i32, i32
  }
}

</mosaic_0001>

<bundles_post_ra>
// kernel: encoder_forward.1
= control target key start
LH: loop header
LB: loop body
LE: loop exit
PB: predicated region body
PF: predicated region fallthrough
CT: control target
= control target key end

     0   :  { %16 = vsyncpa [#allocation3], 0  ;;  %s1319_s0 = inlined_call_operand.vmem [shape: bf16[8,128], index: 0, kind: input, shape index: {}]   ;;  %s1320_s1 = inlined_call_operand.hbm [shape: bf16[128,256], index: 1, kind: input, shape index: {}]   ;;  %s1321_s2 = inlined_call_operand.vmem [shape: f32[1,256], index: 2, kind: input, shape index: {}]   ;;  %s1322_s3 = inlined_call_operand.hbm [shape: bf16[256,128], index: 3, kind: input, shape index: {}]   ;;  %s1323_s4 = inlined_call_operand.vmem [shape: f32[1,128], index: 4, kind: input, shape index: {}]   ;;  %s1324_s5 = inlined_call_operand.vmem [shape: bf16[128,128], index: 5, kind: input, shape index: {}]   ;;  %s1325_s6 = inlined_call_operand.vmem [shape: f32[1,128], index: 6, kind: input, shape index: {}]   ;;  %s1326_s7 = inlined_call_operand.hbm [shape: bf16[128,128], index: 7, kind: input, shape index: {}]   ;;  %s1327_s8 = inlined_call_operand.vmem [shape: f32[1,128], index: 8, kind: input, shape index: {}]   ;;  %s1328_s9 = inlined_call_operand.hbm [shape: bf16[128,128], index: 9, kind: input, shape index: {}]   ;;  %s1329_s10 = inlined_call_operand.vmem [shape: f32[1,128], index: 10, kind: input, shape index: {}]   ;;  %s1330_s11 = inlined_call_operand.vmem [shape: bf16[8,128], index: 11, kind: output, shape index: {}]  }
   0x1   :  { %17 = vsyncpa [#allocation5], 0 }
   0x2   :  { %18 = vsyncpa [#allocation8], 0  ;;  %s1109_s17 = smov [#allocation4]   ;;  %s1015_s21 = scalar_lea.hbm %s1322_s3, 2048 }
   0x3   :  { %s40_s18 = sshll.u32 %s1109_s17, 4  ;;  %p1016_p0 = scmp.ne.s32.totalorder %s1322_s3, %s1015_s21  ;;  %s41_s18 = int_to_ptr.vmem [resolvable:$true] %s40_s18 }
   0x4   :  { %p1019_p1 = scmp.lt.u32.totalorder %s1015_s21, %s1322_s3 }
   0x6   :  { %p1021_p2 = pnand %p1019_p1, %p1016_p0 }
   0x8   :  { %1024 = shalt.err (!%p1021_p2)
}
   0x9   :  { %s1025_s26 = scalar_lea.vmem %s41_s18, 2048  ;;  %p1030_p4 = scmp.lt.s32.totalorder %s41_s18, %s41_s18 }
   0xa   :  { %p1026_p3 = scmp.ne.s32.totalorder %s41_s18, %s1025_s26  ;;  %p1031_p5 = scmp.lt.s32.totalorder %s1025_s26, %s1025_s26 }
   0xc   :  { %p1032_p6 = por %p1031_p5, %p1030_p4 }
   0xe   :  { %p1033_p7 = pnand %p1032_p6, %p1026_p3 }
  0x10   :  { %1036 = shalt.err (!%p1033_p7)
}
  0x11   :  { %s1110_s27 = smov 64   ;;  %s1111_s28 = smov 4  }
  0x12   :  { %46 = dma.hbm_to_vmem [thread:$0]  %s1322_s3, 2048, %s41_s18, [#allocation5], %s1110_s27, %s1110_s27, %s1111_s28  }
  0x13   :  { %s1112_s12 = smov [#allocation2]   ;;  %s1037_s16 = scalar_lea.hbm %s1320_s1, 2048 }
  0x14   :  { %s26_s13 = sshll.u32 %s1112_s12, 4  ;;  %p1038_p8 = scmp.ne.s32.totalorder %s1320_s1, %s1037_s16  ;;  %s27_s13 = int_to_ptr.vmem [resolvable:$true] %s26_s13 }
  0x15   :  { %p1041_p9 = scmp.lt.u32.totalorder %s1037_s16, %s1320_s1 }
  0x17   :  { %p1043_p10 = pnand %p1041_p9, %p1038_p8 }
  0x19   :  { %1046 = shalt.err (!%p1043_p10)
}
  0x1a   :  { %s1047_s22 = scalar_lea.vmem %s27_s13, 2048  ;;  %p1052_p12 = scmp.lt.s32.totalorder %s27_s13, %s27_s13 }
  0x1b   :  { %p1048_p11 = scmp.ne.s32.totalorder %s27_s13, %s1047_s22  ;;  %p1053_p13 = scmp.lt.s32.totalorder %s1047_s22, %s1047_s22 }
  0x1d   :  { %p1054_p0 = por %p1053_p13, %p1052_p12 }
  0x1f   :  { %p1055_p1 = pnand %p1054_p0, %p1048_p11 }
  0x21   :  { %1058 = shalt.err (!%p1055_p1)
}
  0x22   :  { %s1113_s3 = smov 128   ;;  %s1114_s18 = smov 8  }
  0x23   :  { %32 = dma.hbm_to_vmem [thread:$0]  %s1320_s1, 2048, %s27_s13, [#allocation3], %s1113_s3, %s1113_s3, %s1114_s18  }
  0x24   :  { %s1115_s25 = smov [#allocation6]   ;;  %s1116_s29 = smov [#allocation7]  }
  0x25   :  { %s58_s26 = sshll.u32 %s1115_s25, 4  ;;  %s72_s30 = sshll.u32 %s1116_s29, 4  ;;  %s59_s26 = int_to_ptr.vmem [resolvable:$true] %s58_s26  ;;  %s1207_s30 = int_to_ptr.vmem [resolvable:$true] %s72_s30 }
  0x26   :  { %s1059_s15 = scalar_lea.hbm %s1326_s7, 1024 }
  0x27   :  { %p1060_p2 = scmp.ne.s32.totalorder %s1326_s7, %s1059_s15  ;;  %p1063_p3 = scmp.lt.u32.totalorder %s1059_s15, %s1326_s7 }
  0x29   :  { %p1065_p4 = pnand %p1063_p3, %p1060_p2 }
  0x2b   :  { %1068 = shalt.err (!%p1065_p4)
}
  0x2c   :  { %s1069_s1 = scalar_lea.vmem %s59_s26, 1024  ;;  %p1074_p6 = scmp.lt.s32.totalorder %s59_s26, %s59_s26 }
  0x2d   :  { %p1070_p5 = scmp.ne.s32.totalorder %s59_s26, %s1069_s1  ;;  %p1075_p7 = scmp.lt.s32.totalorder %s1069_s1, %s1069_s1 }
  0x2f   :  { %p1076_p8 = por %p1075_p7, %p1074_p6 }
  0x31   :  { %p1077_p9 = pnand %p1076_p8, %p1070_p5 }
  0x33   :  { %1080 = shalt.err (!%p1077_p9)
}
  0x34   :  { %64 = dma.hbm_to_vmem [thread:$0]  %s1326_s7, 1024, %s59_s26, [#allocation5], %s1110_s27, %s1110_s27, %s1111_s28  }
  0x35   :  { %s1081_s18 = scalar_lea.hbm %s1328_s9, 1024 }
  0x36   :  { %p1082_p10 = scmp.ne.s32.totalorder %s1328_s9, %s1081_s18  ;;  %p1085_p11 = scmp.lt.u32.totalorder %s1081_s18, %s1328_s9 }
  0x38   :  { %p1087_p12 = pnand %p1085_p11, %p1082_p10 }
  0x3a   :  { %1090 = shalt.err (!%p1087_p12)
}
  0x3b   :  { %s1091_s12 = scalar_lea.vmem %s1207_s30, 1024  ;;  %p1096_p0 = scmp.lt.s32.totalorder %s1207_s30, %s1207_s30 }
  0x3c   :  { %p1092_p13 = scmp.ne.s32.totalorder %s1207_s30, %s1091_s12  ;;  %p1097_p1 = scmp.lt.s32.totalorder %s1091_s12, %s1091_s12 }
  0x3e   :  { %p1098_p2 = por %p1097_p1, %p1096_p0 }
  0x40   :  { %p1099_p3 = pnand %p1098_p2, %p1092_p13 }
  0x42   :  { %1102 = shalt.err (!%p1099_p3)
}
  0x43   :  { %78 = dma.hbm_to_vmem [thread:$0]  %s1328_s9, 1024, %s1207_s30, [#allocation8], %s1110_s27, %s1110_s27, %s1111_s28  }
  0x44   :  { %1103 = dma.done.wait [#allocation3], 2048  }
  0x45   :  { %1104 = vsyncadd [#allocation3], 4294965248 }
  0x46   :  { %1105 = dma.done.wait [#allocation5], 3072  }
  0x47   :  { %1106 = vsyncadd [#allocation5], 4294964224 }
  0x48   :  { %1107 = dma.done.wait [#allocation8], 1024  }
  0x49   :  { %1108 = vsyncadd [#allocation8], 4294966272  ;;  %v1117_v0 = vmov 0   ;;  %v951_v1 = vld [vmem:[#allocation2 + $0x4] ss:$8 sps:$4 sm:$0xff]   ;;  %v979_v15 = vld [vmem:[#allocation4 + $0x50] sm:$0xff]   ;;  %v113_v41 = vlaneseq }
  0x4a   :  { %235 = vmatprep.mubr.bf16.mxu0 %v1117_v0  ;;  %v953_v2 = vld [vmem:[#allocation2] ss:$8 sps:$4 sm:$0xff]   ;;  %203 = vmatprep.subr.bf16.mxu0 %v951_v1  ;;  %v954_v3 = vld [vmem:[#allocation2 + $0x14] ss:$8 sps:$4 sm:$0xff]   ;;  %v956_v4 = vld [vmem:[#allocation2 + $0x10] ss:$8 sps:$4 sm:$0xff]  }
  0x4b   :  { %204 = vmatpush1.bf16.msra.mxu0 %v953_v2  ;;  %v957_v5 = vld [vmem:[#allocation2 + $0x24] ss:$8 sps:$4 sm:$0xff]   ;;  %v959_v6 = vld [vmem:[#allocation2 + $0x20] ss:$8 sps:$4 sm:$0xff]   ;;  %v960_v7 = vld [vmem:[#allocation2 + $0x34] ss:$8 sps:$4 sm:$0xff]  }
  0x4c   :  { %205 = vmatprep.subr.bf16.mxu0 %v954_v3  ;;  %v962_v8 = vld [vmem:[#allocation2 + $0x30] ss:$8 sps:$4 sm:$0xff]   ;;  %v963_v9 = vld [vmem:[#allocation2 + $0x44] ss:$8 sps:$4 sm:$0xff]   ;;  %v965_v12 = vld [vmem:[#allocation2 + $0x40] ss:$8 sps:$4 sm:$0xff]  }
  0x4d   :  { %v975_v10 = vld [vmem:[#allocation4 + $0x40] sm:$0xff]   ;;  %v977_v13 = vld [vmem:[#allocation4 + $0x48] sm:$0xff]   ;;  %v966_v16 = vld [vmem:[#allocation2 + $0x54] ss:$8 sps:$4 sm:$0xff]   ;;  %v1118_v35 = vmov 0.0   ;;  %v114_v42 = vshrl.u32 %v113_v41, 7 }
  0x4e   :  { %v976_v11 = vld [vmem:[#allocation4] sm:$0xff]   ;;  %831 = vmatprep.subr.bf16.mxu1 %v975_v10  ;;  %v978_v14 = vld [vmem:[#allocation4 + $0x8] sm:$0xff]   ;;  %v968_v17 = vld [vmem:[#allocation2 + $0x50] ss:$8 sps:$4 sm:$0xff]   ;;  %vm1119_vm0 = vmmov 0  }
  0x4f   :  { %206 = vmatpush1.bf16.msra.mxu0 %v956_v4  ;;  %832 = vmatpush3.bf16.msra.mxu1 %v976_v11  ;;  %v980_v18 = vld [vmem:[#allocation4 + $0x10] sm:$0xff]   ;;  %v981_v19 = vld [vmem:[#allocation4 + $0x58] sm:$0xff]   ;;  %v969_v20 = vld [vmem:[#allocation2 + $0x64] ss:$8 sps:$4 sm:$0xff]   ;;  %v115_v43 = vsub.s32 0, %v114_v42  ;;  %v119_v45 = vsub.s32 1, %v114_v42 }
  0x50   :  { %207 = vmatprep.subr.bf16.mxu0 %v957_v5  ;;  %833 = vmatprep.subr.bf16.mxu1 %v977_v13  ;;  %v971_v21 = vld [vmem:[#allocation2 + $0x60] ss:$8 sps:$4 sm:$0xff]   ;;  %v972_v22 = vld [vmem:[#allocation2 + $0x74] ss:$8 sps:$4 sm:$0xff]   ;;  %v974_v26 = vld [vmem:[#allocation2 + $0x70] ss:$8 sps:$4 sm:$0xff]  }
  0x51   :  { %v982_v23 = vld [vmem:[#allocation4 + $0x18] sm:$0xff]   ;;  %v983_v24 = vld [vmem:[#allocation4 + $0x60] sm:$0xff]   ;;  %v985_v27 = vld [vmem:[#allocation4 + $0x68] sm:$0xff]  }
  0x52   :  { %v984_v25 = vld [vmem:[#allocation4 + $0x20] sm:$0xff]   ;;  %v986_v28 = vld [vmem:[#allocation4 + $0x28] sm:$0xff]   ;;  %v987_v30 = vld [vmem:[#allocation4 + $0x70] sm:$0xff]  }
  0x53   :  { %208 = vmatpush1.bf16.msra.mxu0 %v959_v6  ;;  %834 = vmatpush3.bf16.msra.mxu1 %v978_v14  ;;  %v94_v29 = vld [vmem:[%s1319_s0] sm:$0xf]  ;;  %v988_v31 = vld [vmem:[#allocation4 + $0x30] sm:$0xff]   ;;  %v989_v32 = vld [vmem:[#allocation4 + $0x78] sm:$0xff]  }
  0x54   :  { %209 = vmatprep.subr.bf16.mxu0 %v960_v7  ;;  %835 = vmatprep.subr.bf16.mxu1 %v979_v15  ;;  %v990_v33 = vld [vmem:[#allocation4 + $0x38] sm:$0xff]   ;;  %v991_v34 = vld [vmem:[%s1324_s5] sm:$0xff]   ;;  %v992_v36 = vld [vmem:[%s1324_s5 + $0x8] sm:$0xff]  }
  0x55   :  { %v993_v37 = vld [vmem:[%s1324_s5 + $0x10] sm:$0xff]   ;;  %v994_v38 = vld [vmem:[%s1324_s5 + $0x18] sm:$0xff]   ;;  %v995_v39 = vld [vmem:[%s1324_s5 + $0x20] sm:$0xff]  }
  0x56   :  { %v996_v40 = vld [vmem:[%s1324_s5 + $0x28] sm:$0xff]   ;;  %v111_v44 = vld [vmem:[%s1321_s2] sm:$0x3]  ;;  %v997_v58 = vld [vmem:[%s1324_s5 + $0x30] sm:$0xff]  }
  0x57   :  { %210 = vmatpush1.bf16.msra.mxu0 %v962_v8  ;;  %836 = vmatpush3.bf16.msra.mxu1 %v980_v18  ;;  %v116_v46 = vrot.slane %v111_v44, %v115_v43  ;;  %v120_v47 = vrot.slane %v111_v44, %v119_v45  ;;  %v998_v59 = vld [vmem:[%s1324_s5 + $0x38] sm:$0xff]   ;;  %v999_v60 = vld [vmem:[#allocation6] sm:$0xff]   ;;  %v1000_v61 = vld [vmem:[#allocation6 + $0x8] sm:$0xff]  }
  0x58   :  { %211 = vmatprep.subr.bf16.mxu0 %v963_v9  ;;  %837 = vmatprep.subr.bf16.mxu1 %v981_v19  ;;  %v1001_v62 = vld [vmem:[#allocation6 + $0x10] sm:$0xff]   ;;  %v1002_v63 = vld [vmem:[#allocation6 + $0x18] sm:$0xff]   ;;  %v1003_v0 = vld [vmem:[#allocation6 + $0x20] sm:$0xff]  }
  0x59   :  { %v1004_v1 = vld [vmem:[#allocation6 + $0x28] sm:$0xff]   ;;  %v787_v3 = vld [vmem:[%s1323_s4] ss:$0 sm:$0xff]  ;;  %v1005_v11 = vld [vmem:[#allocation6 + $0x30] sm:$0xff]  }
  0x5a   :  { %v1007_v13 = vld [vmem:[#allocation7] sm:$0xff]   ;;  %v1008_v14 = vld [vmem:[#allocation7 + $0x8] sm:$0xff]   ;;  %v1009_v15 = vld [vmem:[#allocation7 + $0x10] sm:$0xff]  }
  0x5b   :  { %212 = vmatpush1.bf16.msra.mxu0 %v965_v12  ;;  %838 = vmatpush3.bf16.msra.mxu1 %v982_v23  ;;  %v1006_v12 = vld [vmem:[#allocation6 + $0x38] sm:$0xff]   ;;  %v1012_v18 = vld [vmem:[#allocation7 + $0x28] sm:$0xff]   ;;  %v804_v19 = vld [vmem:[%s1325_s6] ss:$0 sm:$0xff] }
  0x5c   :  { %213 = vmatprep.subr.bf16.mxu0 %v966_v16  ;;  %839 = vmatprep.subr.bf16.mxu1 %v983_v24  ;;  %v1010_v16 = vld [vmem:[#allocation7 + $0x18] sm:$0xff]  }
  0x5f   :  { %214 = vmatpush1.bf16.msra.mxu0 %v968_v17  ;;  %840 = vmatpush3.bf16.msra.mxu1 %v984_v25  ;;  %v1011_v17 = vld [vmem:[#allocation7 + $0x20] sm:$0xff]  }
  0x60   :  { %215 = vmatprep.subr.bf16.mxu0 %v969_v20  ;;  %841 = vmatprep.subr.bf16.mxu1 %v985_v27  ;;  %v1013_v27 = vld [vmem:[#allocation7 + $0x30] sm:$0xff]  }
  0x63   :  { %216 = vmatpush1.bf16.msra.mxu0 %v971_v21  ;;  %842 = vmatpush3.bf16.msra.mxu1 %v986_v28  ;;  %v1014_v28 = vld [vmem:[#allocation7 + $0x38] sm:$0xff]  }
  0x64   :  { %217 = vmatprep.subr.bf16.mxu0 %v972_v22  ;;  %843 = vmatprep.subr.bf16.mxu1 %v987_v30 }
  0x67   :  { %218 = vmatpush1.bf16.msra.mxu0 %v974_v26  ;;  %844 = vmatpush3.bf16.msra.mxu1 %v988_v31 }
  0x68   :  { %845 = vmatprep.subr.bf16.mxu1 %v989_v32  ;;  %880 = vmatprep.subr.bf16.mxu0 %v1118_v35 }
  0x6a   :  { %236 = vmatmul.mubr.bf16.vlgmr.msra.gmra.mrb[0].mxu0 %v94_v29  ;;  %v813_v29 = vld [vmem:[%s1327_s8] ss:$0 sm:$0xff] }
  0x6b   :  { %846 = vmatpush3.bf16.msra.mxu1 %v990_v33  ;;  %881 = vmatpush3.bf16.msra.mxu0 %v991_v34 }
  0x6c   :  { %900 = vmatprep.subr.bf16.mxu1 %v1118_v35  ;;  %882 = vmatprep.subr.bf16.mxu0 %v1118_v35 }
  0x6d   :  { %896 = vmatprep.mubr.msk.bf16.mxu0 %vm1119_vm0, %v1118_v35 }
  0x6f   :  { %883 = vmatpush3.bf16.msra.mxu0 %v992_v36 }
  0x70   :  { %884 = vmatprep.subr.bf16.mxu0 %v1118_v35 }
  0x73   :  { %885 = vmatpush3.bf16.msra.mxu0 %v993_v37 }
  0x74   :  { %886 = vmatprep.subr.bf16.mxu0 %v1118_v35 }
  0x77   :  { %887 = vmatpush3.bf16.msra.mxu0 %v994_v38  ;;  %v822_v38 = vld [vmem:[%s1329_s10] ss:$0 sm:$0xff] }
  0x78   :  { %888 = vmatprep.subr.bf16.mxu0 %v1118_v35 }
  0x7b   :  { %889 = vmatpush3.bf16.msra.mxu0 %v995_v39 }
  0x7c   :  { %890 = vmatprep.subr.bf16.mxu0 %v1118_v35 }
  0x7f   :  { %891 = vmatpush3.bf16.msra.mxu0 %v996_v40 }
  0x80   :  { %892 = vmatprep.subr.bf16.mxu0 %v1118_v35 }
  0x83   :  { %893 = vmatpush3.bf16.msra.mxu0 %v997_v58 }
  0x84   :  { %894 = vmatprep.subr.bf16.mxu0 %v1118_v35 }
  0x87   :  { %895 = vmatpush3.bf16.msra.mxu0 %v998_v59 }
  0x88   :  { %920 = vmatprep.subr.bf16.mxu0 %v1118_v35 }
 0x13d   :  { %v237_v48 = vpop.f32.mrb[0].mxu0 }
 0x13e   :  { %v238_v49 = vadd.f32 %v237_v48, %v116_v46  ;;  %v239_v50 = vpop.f32.mrb[1].mxu0 }
 0x13f   :  { %v240_v51 = vadd.f32 %v239_v50, %v120_v47  ;;  %v241_v52 = vpop.f32.mrb[2].mxu0 }
 0x140   :  { %v244_v53 = vmax.f32 %v238_v49, 0.0  ;;  %v242_v54 = vpop.f32.mrb[3].mxu0 }
 0x141   :  { %v245_v55 = vmax.f32 %v240_v51, 0.0 }
 0x142   :  { %v246_v57 = vpack.c.bf16 %v244_v53, %v244_v53 }
 0x143   :  { %v247_v56 = vpack.c.bf16 %v245_v55, %v245_v55 }
 0x145   :  { %415 = vmatprep.mubr.bf16.mxu1 %v247_v56 }
 0x146   :  { %416 = vmatmul.mubr.bf16.vlgmr.msra.gmra.mrb[0].mxu1 %v246_v57 }
 0x147   :  { %916 = vmatprep.mubr.msk.bf16.mxu1 %vm1119_vm0, %v1118_v35  ;;  %901 = vmatpush3.bf16.msra.mxu1 %v999_v60 }
 0x148   :  { %902 = vmatprep.subr.bf16.mxu1 %v1118_v35 }
 0x14b   :  { %903 = vmatpush3.bf16.msra.mxu1 %v1000_v61 }
 0x14c   :  { %904 = vmatprep.subr.bf16.mxu1 %v1118_v35 }
 0x14f   :  { %905 = vmatpush3.bf16.msra.mxu1 %v1001_v62 }
 0x150   :  { %906 = vmatprep.subr.bf16.mxu1 %v1118_v35 }
 0x153   :  { %907 = vmatpush3.bf16.msra.mxu1 %v1002_v63 }
 0x154   :  { %908 = vmatprep.subr.bf16.mxu1 %v1118_v35 }
 0x157   :  { %909 = vmatpush3.bf16.msra.mxu1 %v1003_v0 }
 0x158   :  { %910 = vmatprep.subr.bf16.mxu1 %v1118_v35 }
 0x15b   :  { %911 = vmatpush3.bf16.msra.mxu1 %v1004_v1 }
 0x15c   :  { %912 = vmatprep.subr.bf16.mxu1 %v1118_v35 }
 0x15f   :  { %913 = vmatpush3.bf16.msra.mxu1 %v1005_v11 }
 0x160   :  { %914 = vmatprep.subr.bf16.mxu1 %v1118_v35 }
 0x163   :  { %915 = vmatpush3.bf16.msra.mxu1 %v1006_v12 }
 0x219   :  { %v847_v2 = vpop.f32.mrb[0].mxu1 }
 0x21a   :  { %v848_v4 = vpop.f32.mrb[1].mxu1 }
 0x21b   :  { %v849_v5 = vadd.f32 %v848_v4, %v847_v2  ;;  %v850_v6 = vpop.f32.mrb[2].mxu1 }
 0x21c   :  { %v851_v7 = vpop.f32.mrb[3].mxu1 }
 0x21d   :  { %v418_v8 = vadd.f32 %v849_v5, %v787_v3 }
 0x21f   :  { %v423_v9 = vmax.f32 %v418_v8, 0.0 }
 0x221   :  { %v424_v10 = vpack.c.bf16 %v423_v9, %v423_v9 }
 0x223   :  { %897 = vmatmul.mubr.bf16.vlgmr.msra.gmra.mrb[4].mxu0 %v424_v10 }
 0x224   :  { %936 = vmatprep.mubr.msk.bf16.mxu0 %vm1119_vm0, %v1118_v35  ;;  %921 = vmatpush3.bf16.msra.mxu0 %v1007_v13 }
 0x225   :  { %922 = vmatprep.subr.bf16.mxu0 %v1118_v35 }
 0x228   :  { %923 = vmatpush3.bf16.msra.mxu0 %v1008_v14 }
 0x229   :  { %924 = vmatprep.subr.bf16.mxu0 %v1118_v35 }
 0x22c   :  { %925 = vmatpush3.bf16.msra.mxu0 %v1009_v15 }
 0x22d   :  { %926 = vmatprep.subr.bf16.mxu0 %v1118_v35 }
 0x230   :  { %927 = vmatpush3.bf16.msra.mxu0 %v1010_v16 }
 0x231   :  { %928 = vmatprep.subr.bf16.mxu0 %v1118_v35 }
 0x234   :  { %929 = vmatpush3.bf16.msra.mxu0 %v1011_v17 }
 0x235   :  { %930 = vmatprep.subr.bf16.mxu0 %v1118_v35 }
 0x238   :  { %931 = vmatpush3.bf16.msra.mxu0 %v1012_v18 }
 0x239   :  { %932 = vmatprep.subr.bf16.mxu0 %v1118_v35 }
 0x23c   :  { %933 = vmatpush3.bf16.msra.mxu0 %v1013_v27 }
 0x23d   :  { %934 = vmatprep.subr.bf16.mxu0 %v1118_v35 }
 0x240   :  { %935 = vmatpush3.bf16.msra.mxu0 %v1014_v28 }
 0x2f6   :  { %v530_v20 = vpop.f32.mrb[4].mxu0 }
 0x2f7   :  { %v531_v21 = vadd.f32 %v804_v19, %v530_v20  ;;  %v898_v22 = vpop.f32.mrb[5].mxu0 }
 0x2f8   :  { %v533_v23 = vpop.f32.mrb[6].mxu0 }
 0x2f9   :  { %v536_v24 = vmax.f32 %v531_v21, 0.0  ;;  %v899_v25 = vpop.f32.mrb[7].mxu0 }
 0x2fb   :  { %v537_v26 = vpack.c.bf16 %v536_v24, %v536_v24 }
 0x2fd   :  { %917 = vmatmul.mubr.bf16.vlgmr.msra.gmra.mrb[4].mxu1 %v537_v26 }
 0x3d0   :  { %v643_v30 = vpop.f32.mrb[4].mxu1 }
 0x3d1   :  { %v644_v31 = vadd.f32 %v813_v29, %v643_v30  ;;  %v918_v32 = vpop.f32.mrb[5].mxu1 }
 0x3d2   :  { %v646_v33 = vpop.f32.mrb[6].mxu1 }
 0x3d3   :  { %v649_v34 = vmax.f32 %v644_v31, 0.0  ;;  %v919_v36 = vpop.f32.mrb[7].mxu1 }
 0x3d5   :  { %v650_v37 = vpack.c.bf16 %v649_v34, %v649_v34 }
 0x3d7   :  { %937 = vmatmul.mubr.bf16.vlgmr.msra.gmra.mrb[8].mxu0 %v650_v37 }
 0x4aa   :  { %v756_v39 = vpop.f32.mrb[8].mxu0 }
 0x4ab   :  { %v757_v35 = vadd.f32 %v822_v38, %v756_v39  ;;  %v938_v40 = vpop.f32.mrb[9].mxu0 }
 0x4ac   :  { %v759_v41 = vpop.f32.mrb[10].mxu0 }
 0x4ad   :  { %v762_v42 = vpack.c.bf16 %v757_v35, %v757_v35  ;;  %v939_v43 = vpop.f32.mrb[11].mxu0 }
 0x4af   :  { %763 = vst [vmem:[%s1330_s11] sm:$0xf] %v762_v42 }
 0x4b0   :  { %768 = vsyncpa [#allocation3], 1 }
 0x4b1   :  { %769 = vsyncpa [#allocation5], 1 }
 0x4b2   :  { %770 = vsyncpa [#allocation8], 1 }

</bundles_post_ra>
